<compile_context>
chip_gen: v6e
topology: v6e:2x2x1
jax: 0.10.0
libtpu: 0.0.40
codegen_flags: <defaults>
</compile_context>

<pallas_src>
import jax
import jax.numpy as jnp
from jax import lax
from jax.experimental import pallas as pl
from jax.experimental.pallas import tpu as pltpu

VMEM_LIMIT_BYTES = 48 * 1024 * 1024   # explicit scoped-VMEM limit (headroom under v7x's 64 MiB)
TILE_BUDGET_BYTES = 4 * 1024 * 1024   # per-block budget so double-buffered working set stays small


def _pick_rows(total, bytes_per_row, budget_bytes, min_steps):
    """Largest divisor `t` of `total` whose block fits `budget_bytes` while
    still giving at least `min_steps` grid steps (when achievable)."""
    divisors = [d for d in range(1, total + 1) if total % d == 0]
    want = min(min_steps, total)
    ok = [d for d in divisors
          if d * bytes_per_row <= budget_bytes and total // d >= want]
    if not ok:
        ok = [d for d in divisors if d * bytes_per_row <= budget_bytes] or [1]
    return max(ok)


# --------------------------------------------------------------------------
# Kernel 1: 3x3 convolution, stride 1, padding 1 (input pre-padded), im2col
# --------------------------------------------------------------------------
def conv3x3_kernel(xpad_ref, w_ref, b_ref, out_ref):
    # xpad_ref: (1, H+2, W+2, Cin)  bf16, resident across h-tiles of a batch
    # w_ref:    (9*Cin, Cout)       bf16
    # b_ref:    (1, Cout)           f32
    # out_ref:  (1, Ht, W, Cout)    f32
    _, Ht, W, Cout = out_ref.shape
    Cin = xpad_ref.shape[-1]

    h = pl.program_id(1)
    row0 = pl.multiple_of(h * Ht, Ht)          # element row offset of this tile

    taps = []
    for dy in range(3):                        # static unrolled taps
        rows = xpad_ref[0, pl.ds(row0 + dy, Ht), :, :]      # (Ht, W+2, Cin)
        for dx in range(3):
            taps.append(rows[:, dx:dx + W, :])              # (Ht, W, Cin)
    # im2col slab: channel order (dy*3+dx)*Cin + cin matches the weight reshape
    patch = jnp.concatenate(taps, axis=-1).reshape(Ht * W, 9 * Cin)

    acc = jnp.dot(patch, w_ref[...], preferred_element_type=jnp.float32)
    acc = acc.reshape(Ht, W, Cout) + b_ref[...]             # bias broadcast
    # TODO(synk): for small Cout (<128) this store is lane-masked; fold W into
    # the lane axis of the conv output (as done for the BN apply pass) if
    # profiling shows the kernel is vst-bound.
    out_ref[0] = acc.astype(out_ref.dtype)


# --------------------------------------------------------------------------
# Kernel 2a: per-conv-channel sum / sum-of-squares (BN pass 1, reduction)
# --------------------------------------------------------------------------
def bn_stats_kernel(y_ref, stat_ref):
    # y_ref: (Rt, W, Ccv) f32      stat_ref: (2, Ccv) f32 (resident accumulator)
    @pl.when(pl.program_id(0) == 0)
    def _init():
        stat_ref[...] = jnp.zeros_like(stat_ref)

    y = y_ref[...].astype(jnp.float32)
    Ccv = y.shape[-1]
    s = jnp.sum(y, axis=(0, 1), keepdims=True).reshape(1, Ccv)
    sq = jnp.sum(y * y, axis=(0, 1), keepdims=True).reshape(1, Ccv)
    stat_ref[0:1, :] += s
    stat_ref[1:2, :] += sq


# --------------------------------------------------------------------------
# Kernel 2b: normalize + affine + exact GELU (BN pass 2, elementwise)
# --------------------------------------------------------------------------
def bn_apply_gelu_kernel(y_ref, scale_ref, shift_ref, o_ref):
    # y_ref/o_ref: (1, Rt, W*Ccv)   scale_ref/shift_ref: (1, W*Ccv)
    y = y_ref[...].astype(jnp.float32)
    z = y * scale_ref[...] + shift_ref[...]
    inv_sqrt2 = jnp.float32(0.7071067811865476)
    out = 0.5 * z * (1.0 + lax.erf(z * inv_sqrt2))          # exact GELU
    o_ref[...] = out.astype(o_ref.dtype)


# --------------------------------------------------------------------------
# Wrapper (NCHW in / NCHW out, like the PyTorch module)
# --------------------------------------------------------------------------
def nerv_block(x_nchw, w_conv, b_conv, gamma, beta, up_scale):
    """
    x_nchw : (N, Cin, H, W)
    w_conv : (3, 3, Cin, Ccv) with Ccv = out_channel * up_scale**2  (HWIO)
    b_conv : (Ccv,)
    gamma  : (out_channel,)   beta : (out_channel,)
    returns: (N, out_channel, H*up_scale, W*up_scale)
    """
    N, Cin, H, W = x_nchw.shape
    Ccv = w_conv.shape[-1]
    r = up_scale
    C = Ccv // (r * r)

    # ---- Conv: NCHW -> NHWC, pad spatial by 1, bf16 MXU operands -----------
    x = jnp.transpose(x_nchw, (0, 2, 3, 1))
    # TODO(synk): handle the padding=1 halo inside the kernel (masked halo rows
    # / element-offset index_map) instead of jnp.pad to save one HBM round
    # trip of the input on HBM-bound generations (v5e).
    xpad = jnp.pad(x, ((0, 0), (1, 1), (1, 1), (0, 0))).astype(jnp.bfloat16)
    w_flat = w_conv.reshape(9 * Cin, Ccv).astype(jnp.bfloat16)
    b2 = b_conv.reshape(1, Ccv).astype(jnp.float32)

    conv_row_bytes = W * Ccv * 4 + 3 * (W + 2) * Cin * 2
    min_h_steps = max(1, -(-8 // N))           # aim for >=8 total grid steps
    Ht = _pick_rows(H, conv_row_bytes, TILE_BUDGET_BYTES, min_h_steps)

    conv_out = pl.pallas_call(
        conv3x3_kernel,
        out_shape=jax.ShapeDtypeStruct((N, H, W, Ccv), jnp.float32),
        grid=(N, H // Ht),
        in_specs=[
            # padded input stays resident in VMEM across the h-tile axis
            pl.BlockSpec((1, H + 2, W + 2, Cin), lambda n, h: (n, 0, 0, 0)),
            pl.BlockSpec((9 * Cin, Ccv), lambda n, h: (0, 0)),
            pl.BlockSpec((1, Ccv), lambda n, h: (0, 0)),
        ],
        out_specs=pl.BlockSpec((1, Ht, W, Ccv), lambda n, h: (n, h, 0, 0)),
        compiler_params=pltpu.CompilerParams(
            dimension_semantics=("parallel", "parallel"),
            vmem_limit_bytes=VMEM_LIMIT_BYTES),
    )(xpad, w_flat, b2)

    # ---- BN pass 1: per-conv-channel sum / sumsq (tiled reduction) ---------
    rows = N * H
    Rt = _pick_rows(rows, W * Ccv * 4 * 2, TILE_BUDGET_BYTES, 8)
    conv_rows = conv_out.reshape(rows, W, Ccv)              # free reshape

    stats = pl.pallas_call(
        bn_stats_kernel,
        out_shape=jax.ShapeDtypeStruct((2, Ccv), jnp.float32),
        grid=(rows // Rt,),
        in_specs=[pl.BlockSpec((Rt, W, Ccv), lambda i: (i, 0, 0))],
        out_specs=pl.BlockSpec((2, Ccv), lambda i: (0, 0)),
        compiler_params=pltpu.CompilerParams(
            dimension_semantics=("arbitrary",),       # reduction into resident output
            vmem_limit_bytes=VMEM_LIMIT_BYTES),
    )(conv_rows)

    # ---- Pool stats over each group of r*r conv channels (tiny, plain JAX) -
    sum_c, sumsq_c = stats[0], stats[1]                      # (Ccv,)
    cnt = jnp.float32(N * H * W * r * r)                     # elems per out-channel
    sum_g = sum_c.reshape(C, r * r).sum(axis=1)
    sumsq_g = sumsq_c.reshape(C, r * r).sum(axis=1)
    mean = sum_g / cnt
    var = jnp.maximum(sumsq_g / cnt - mean * mean, 0.0)      # biased variance
    scale_out = gamma.astype(jnp.float32) * lax.rsqrt(var + 1e-5)
    shift_out = beta.astype(jnp.float32) - mean * scale_out
    scale_cv = jnp.repeat(scale_out, r * r)                  # (Ccv,) back to conv chans
    shift_cv = jnp.repeat(shift_out, r * r)

    # ---- BN pass 2: normalize + affine + GELU on lane-dense (Rt, W*Ccv) ----
    WC = W * Ccv
    n_tiles = rows // Rt
    conv_tiles = conv_out.reshape(n_tiles, Rt, WC)           # free reshape
    scale_row = jnp.tile(scale_cv, W).reshape(1, WC)         # lane idx = w*Ccv + c
    shift_row = jnp.tile(shift_cv, W).reshape(1, WC)

    act = pl.pallas_call(
        bn_apply_gelu_kernel,
        out_shape=jax.ShapeDtypeStruct((n_tiles, Rt, WC), jnp.float32),
        grid=(n_tiles,),
        in_specs=[
            pl.BlockSpec((1, Rt, WC), lambda i: (i, 0, 0)),
            pl.BlockSpec((1, WC), lambda i: (0, 0)),
            pl.BlockSpec((1, WC), lambda i: (0, 0)),
        ],
        out_specs=pl.BlockSpec((1, Rt, WC), lambda i: (i, 0, 0)),
        compiler_params=pltpu.CompilerParams(
            dimension_semantics=("parallel",),
            vmem_limit_bytes=VMEM_LIMIT_BYTES),
    )(conv_tiles, scale_row, shift_row)

    # ---- PixelShuffle (pure permutation, commutes with BN/GELU) + NCHW -----
    y = act.reshape(N, H, W, C, r, r)
    y = jnp.transpose(y, (0, 1, 4, 2, 5, 3)).reshape(N, H * r, W * r, C)
    return jnp.transpose(y, (0, 3, 1, 2))


if __name__ == "__main__":
    # small, deterministic example consistent with the module
    N, in_channel, H, W = 2, 4, 16, 16
    out_channel, up_scale = 4, 2
    Ccv = out_channel * up_scale * up_scale

    key = jax.random.PRNGKey(0)
    kx, kw, kb, kg, kbt = jax.random.split(key, 5)

    x = jax.random.normal(kx, (N, in_channel, H, W), dtype=jnp.float32)
    # Conv2d weight stored HWIO for the NHWC kernel, kaiming-ish scale
    w_conv = jax.random.normal(kw, (3, 3, in_channel, Ccv),
                               dtype=jnp.float32) * 0.1
    b_conv = jax.random.normal(kb, (Ccv,), dtype=jnp.float32) * 0.1
    # BatchNorm2d affine params (perturbed so the affine path is exercised)
    gamma = 1.0 + 0.1 * jax.random.normal(kg, (out_channel,), dtype=jnp.float32)
    beta = 0.1 * jax.random.normal(kbt, (out_channel,), dtype=jnp.float32)

    out = nerv_block(x, w_conv, b_conv, gamma, beta, up_scale)
    jax.block_until_ready(out)
    assert out.shape == (N, out_channel, H * up_scale, W * up_scale)
    print("KERNEL_OK")
</pallas_src>

<mosaic_0001>
module attributes {stable_mosaic.version = 11 : i64} {
  func.func @conv3x3_kernel(%arg0: i32, %arg1: i32, %arg2: memref<1x18x18x4xbf16, #tpu.memory_space<vmem>>, %arg3: memref<36x16xbf16, #tpu.memory_space<vmem>>, %arg4: memref<1x16xf32, #tpu.memory_space<vmem>>, %arg5: memref<1x4x16x16xf32, #tpu.memory_space<vmem>>) attributes {dimension_semantics = [#tpu.dimension_semantics<parallel>, #tpu.dimension_semantics<parallel>], iteration_bounds = array<i64: 2, 4>, scalar_prefetch = 0 : i64, scratch_operands = 0 : i64, tpu.core_type = #tpu.core_type<tc>, window_params = [{transform_indices = @transform_0, window_bounds = array<i64: 1, 18, 18, 4>}, {pipeline_mode = #tpu.pipeline_mode<synchronous>, transform_indices = @transform_1, window_bounds = array<i64: 36, 16>}, {pipeline_mode = #tpu.pipeline_mode<synchronous>, transform_indices = @transform_2, window_bounds = array<i64: 1, 16>}, {transform_indices = @transform_3, window_bounds = array<i64: 1, 4, 16, 16>}]} {
    %c4_i32 = arith.constant 4 : i32
    %0 = arith.muli %arg1, %c4_i32 : i32
    %1 = tpu.assume_multiple %0, 4 : i32
    %c0_i32 = arith.constant 0 : i32
    %2 = arith.addi %1, %c0_i32 : i32
    %c0 = arith.constant 0 : index
    %3 = arith.index_cast %2 : i32 to index
    %c0_0 = arith.constant 0 : index
    %c0_1 = arith.constant 0 : index
    %4 = vector.load %arg2[%c0, %3, %c0_0, %c0_1] : memref<1x18x18x4xbf16, #tpu.memory_space<vmem>>, vector<1x4x18x4xbf16>
    %5 = vector.shape_cast %4 : vector<1x4x18x4xbf16> to vector<4x18x4xbf16>
    %6 = vector.extract_strided_slice %5 {offsets = [0, 0, 0], sizes = [4, 16, 4], strides = [1, 1, 1]} : vector<4x18x4xbf16> to vector<4x16x4xbf16>
    %7 = vector.extract_strided_slice %5 {offsets = [0, 1, 0], sizes = [4, 16, 4], strides = [1, 1, 1]} : vector<4x18x4xbf16> to vector<4x16x4xbf16>
    %8 = vector.extract_strided_slice %5 {offsets = [0, 2, 0], sizes = [4, 16, 4], strides = [1, 1, 1]} : vector<4x18x4xbf16> to vector<4x16x4xbf16>
    %c1_i32 = arith.constant 1 : i32
    %9 = arith.addi %1, %c1_i32 : i32
    %c0_2 = arith.constant 0 : index
    %10 = arith.index_cast %9 : i32 to index
    %c0_3 = arith.constant 0 : index
    %c0_4 = arith.constant 0 : index
    %11 = vector.load %arg2[%c0_2, %10, %c0_3, %c0_4] : memref<1x18x18x4xbf16, #tpu.memory_space<vmem>>, vector<1x4x18x4xbf16>
    %12 = vector.shape_cast %11 : vector<1x4x18x4xbf16> to vector<4x18x4xbf16>
    %13 = vector.extract_strided_slice %12 {offsets = [0, 0, 0], sizes = [4, 16, 4], strides = [1, 1, 1]} : vector<4x18x4xbf16> to vector<4x16x4xbf16>
    %14 = vector.extract_strided_slice %12 {offsets = [0, 1, 0], sizes = [4, 16, 4], strides = [1, 1, 1]} : vector<4x18x4xbf16> to vector<4x16x4xbf16>
    %15 = vector.extract_strided_slice %12 {offsets = [0, 2, 0], sizes = [4, 16, 4], strides = [1, 1, 1]} : vector<4x18x4xbf16> to vector<4x16x4xbf16>
    %c2_i32 = arith.constant 2 : i32
    %16 = arith.addi %1, %c2_i32 : i32
    %c0_5 = arith.constant 0 : index
    %17 = arith.index_cast %16 : i32 to index
    %c0_6 = arith.constant 0 : index
    %c0_7 = arith.constant 0 : index
    %18 = vector.load %arg2[%c0_5, %17, %c0_6, %c0_7] : memref<1x18x18x4xbf16, #tpu.memory_space<vmem>>, vector<1x4x18x4xbf16>
    %19 = vector.shape_cast %18 : vector<1x4x18x4xbf16> to vector<4x18x4xbf16>
    %20 = vector.extract_strided_slice %19 {offsets = [0, 0, 0], sizes = [4, 16, 4], strides = [1, 1, 1]} : vector<4x18x4xbf16> to vector<4x16x4xbf16>
    %21 = vector.extract_strided_slice %19 {offsets = [0, 1, 0], sizes = [4, 16, 4], strides = [1, 1, 1]} : vector<4x18x4xbf16> to vector<4x16x4xbf16>
    %22 = vector.extract_strided_slice %19 {offsets = [0, 2, 0], sizes = [4, 16, 4], strides = [1, 1, 1]} : vector<4x18x4xbf16> to vector<4x16x4xbf16>
    %23 = tpu.concatenate %6, %7, %8, %13, %14, %15, %20, %21, %22 in 2 : vector<4x16x4xbf16>, vector<4x16x4xbf16>, vector<4x16x4xbf16>, vector<4x16x4xbf16>, vector<4x16x4xbf16>, vector<4x16x4xbf16>, vector<4x16x4xbf16>, vector<4x16x4xbf16>, vector<4x16x4xbf16> -> vector<4x16x36xbf16>
    %24 = vector.shape_cast %23 : vector<4x16x36xbf16> to vector<64x36xbf16>
    %c0_8 = arith.constant 0 : index
    %c0_9 = arith.constant 0 : index
    %25 = vector.load %arg3[%c0_8, %c0_9] : memref<36x16xbf16, #tpu.memory_space<vmem>>, vector<36x16xbf16>
    %cst = arith.constant dense<0.000000e+00> : vector<64x16xf32>
    %26 = tpu.matmul %24, %25, %cst {dimension_numbers = #tpu.dot_dimension_numbers<[1], [0], [0], [1], [0, 0, 1, 1], [], []>} : vector<64x36xbf16>, vector<36x16xbf16>, vector<64x16xf32> -> vector<64x16xf32>
    %27 = vector.shape_cast %26 : vector<64x16xf32> to vector<4x16x16xf32>
    %c0_10 = arith.constant 0 : index
    %c0_11 = arith.constant 0 : index
    %28 = vector.load %arg4[%c0_10, %c0_11] : memref<1x16xf32, #tpu.memory_space<vmem>>, vector<1x16xf32>
    %29 = vector.shape_cast %28 : vector<1x16xf32> to vector<1x1x16xf32>
    %30 = vector.broadcast %29 : vector<1x1x16xf32> to vector<4x16x16xf32>
    %31 = arith.addf %27, %30 : vector<4x16x16xf32>
    %c0_12 = arith.constant 0 : index
    %c0_13 = arith.constant 0 : index
    %c0_14 = arith.constant 0 : index
    %c0_15 = arith.constant 0 : index
    %32 = vector.load %arg5[%c0_12, %c0_13, %c0_14, %c0_15] : memref<1x4x16x16xf32, #tpu.memory_space<vmem>>, vector<1x4x16x16xf32>
    %33 = vector.shape_cast %32 : vector<1x4x16x16xf32> to vector<4x16x16xf32>
    %34 = vector.shape_cast %31 : vector<4x16x16xf32> to vector<1x4x16x16xf32>
    tpu.vector_store %arg5[%c0_12, %c0_13, %c0_14, %c0_15], %34 {strides = array<i32>} : memref<1x4x16x16xf32, #tpu.memory_space<vmem>>, vector<1x4x16x16xf32>,
    return
  }
  func.func @transform_0(%arg0: i32, %arg1: i32) -> (i32, i32, i32, i32) {
    %c0_i32 = arith.constant 0 : i32
    %c0_i32_0 = arith.constant 0 : i32
    %c0_i32_1 = arith.constant 0 : i32
    %c0_i32_2 = arith.constant 0 : i32
    return %arg0, %c0_i32, %c0_i32_0, %c0_i32_1 : i32, i32, i32, i32
  }
  func.func @transform_1(%arg0: i32, %arg1: i32) -> (i32, i32) {
    %c0_i32 = arith.constant 0 : i32
    %c0_i32_0 = arith.constant 0 : i32
    %c0_i32_1 = arith.constant 0 : i32
    return %c0_i32, %c0_i32_0 : i32, i32
  }
  func.func @transform_2(%arg0: i32, %arg1: i32) -> (i32, i32) {
    %c0_i32 = arith.constant 0 : i32
    %c0_i32_0 = arith.constant 0 : i32
    %c0_i32_1 = arith.constant 0 : i32
    return %c0_i32, %c0_i32_0 : i32, i32
  }
  func.func @transform_3(%arg0: i32, %arg1: i32) -> (i32, i32, i32, i32) {
    %c0_i32 = arith.constant 0 : i32
    %c0_i32_0 = arith.constant 0 : i32
    %c0_i32_1 = arith.constant 0 : i32
    return %arg0, %arg1, %c0_i32, %c0_i32_0 : i32, i32, i32, i32
  }
}

</mosaic_0001>

<bundles_post_ra>
// kernel: tpu_custom_call.1
= control target key start
LH: loop header
LB: loop body
LE: loop exit
PB: predicated region body
PF: predicated region fallthrough
CT: control target
= control target key end

     0   :  { %8 = vsyncpa [#allocation3], 0  ;;  %s1554_s0 = inlined_call_operand.vmem [shape: bf16[2,18,18,4], index: 0, kind: input, shape index: {}]   ;;  %s1555_s1 = inlined_call_operand.vmem [shape: bf16[36,16], index: 1, kind: input, shape index: {}]   ;;  %s1556_s2 = inlined_call_operand.vmem [shape: f32[1,16], index: 2, kind: input, shape index: {}]   ;;  %s1557_s3 = inlined_call_operand.hbm [shape: f32[2,16,16,16], index: 3, kind: output, shape index: {}]  }
   0x1   :  { %10 = vsyncpa [#allocation3 + $0x1], 0  ;;  %s1211_s12 = smov 0   ;;  %s1213_s13 = smov 0  }
   0x2   :  { %s1215_s14 = smov 0   ;;  %s1217_s15 = smov 0  }
   0x3   :  { %s1219_s16 = smov 0   ;;  %s1221_s17 = smov 0  }
   0x4   :  { %s1223_s18 = smov 0   ;;  %s1225_s19 = smov 0  }
   0x5 LB: > { %s871_s20 = sadd.s32 4294967295, %s1179_s19   ;;  %s872_s21 = sadd.s32 4294967294, %s1179_s19   ;;  %s1179_s19 = sphi %s1225_s19, %s16_s19   ;;  %s1175_s18 = sphi %s1223_s18, %s1566_s18   ;;  %s1171_s17 = sphi %s1221_s17, %s1565_s17   ;;  %s1167_s16 = sphi %s1219_s16, %s1564_s16   ;;  %s1163_s15 = sphi %s1217_s15, %s1563_s15   ;;  %s1159_s14 = sphi %s1215_s14, %s1562_s14   ;;  %s1155_s13 = sphi %s1213_s13, %s1561_s13   ;;  %s1151_s12 = sphi %s1211_s12, %s1560_s12  }
   0x6   : > { %s25_s22 = sadd.s32 1, %s1171_s17  ;;  %s28_s23 = sadd.s32 1, %s1175_s18 }
   0x7   : > { %p26_p0 = scmp.ge.s32.totalorder %s25_s22, 4  ;;  %p115_p1 = scmp.ne.s32.totalorder %s1159_s14, %s1155_s13 }
   0x8   : > { %p116_p2 = scmp.eq.s32.totalorder %s871_s20, 7  ;;  %p121_p5 = scmp.ne.s32.totalorder %s1155_s13, %s1151_s12 }
   0x9   : > { %s1568_s22 = smov (%p26_p0, %s25_s22), 0  ;;  %s1570_s23 = smov (!%p26_p0, %s28_s23), %s1175_s18 }
   0xa   : > { %s101_s24 = ssub.s32 %s1171_s17, %s1568_s22  ;;  %p1262_p3 = por %p116_p2, %p115_p1 }
   0xb   : > { %p30_p4 = scmp.ge.s32.totalorder %s1570_s23, 2  ;;  %p122_p6 = scmp.eq.s32.totalorder %s872_s21, 7 }
   0xc   : > { %p875_p7 = scmp.ge.s32.totalorder %s1179_s19, 1  ;;  %p154_p9 = scmp.lt.s32.totalorder %s1179_s19, 9 }
   0xd   : > { %s1572_s23 = smov (%p30_p4, %s1570_s23), 0  ;;  %p1271_p8 = por %p122_p6, %p121_p5 }
   0xe   : > { %s100_s27 = ssub.s32 %s1175_s18, %s1572_s23  ;;  %s105_s28 = sadd.s32 1, %s1159_s14 }
   0xf   : > { %s102_s29 = sor.u32 %s101_s24, %s100_s27  ;;  %p155_p10 = pnand %p875_p7, %p154_p9 }
  0x10   : > { %p103_p11 = scmp.eq.s32.totalorder %s102_s29, 0  ;;  %p178_p12 = scmp.lt.s32.totalorder (!%p155_p10), %s1167_s16, 1 }
  0x11   : > { %158 = sbr.rel (%p155_p10) target bundleno = 421 (0x1a5), region = 32  ;;  %s1181_s11 = smov (!%p155_p10), 12  }
  0x12   : > { %s1280_s30 = scalar_select %p103_p11, %s1159_s14, %s105_s28  }
  0x13   : > { %s948_s5 = smul.u32 (!%p155_p10), 48, %s1163_s15  ;;  %s1182_s20 = smov (!%p155_p10), 8  }
  0x14   : > { %s1183_s21 = smov (!%p155_p10), 4   ;;  %s1184_s24 = smov (!%p155_p10), 16  }
  0x15   : > { %s1185_s27 = smov (!%p155_p10), 20   ;;  %s949_s28 = sshll.u32 (!%p155_p10), %s1163_s15, 3 }
  0x16   : > { %s179_s4 = scalar_select %p178_p12, %s1167_s16, 1  ;;  %vm322_vm0 = vcmask 1046528   ;;  %vm265_vm1 = vsmask.f32 7424  ;;  %vm676_vm2 = vcmask 1041408   ;;  %vm575_vm3 = vcmask 31744  }
  0x17   : > { %vm584_vm4 = vcmask 64512   ;;  %vm593_vm5 = vcmask 97280   ;;  %vm602_vm6 = vcmask 130048   ;;  %vm611_vm7 = vcmask 162816   ;;  %s944_s29 = sshll.u32 %s1167_s16, 5 }
  0x18   : > { %s979_s6 = smul.u32 216, %s179_s4  ;;  %vm620_vm8 = vcmask 195584   ;;  %vm629_vm9 = vcmask 228352   ;;  %vm638_vm10 = vcmask 261120   ;;  %vm667_vm11 = vcmask 293888   ;;  %s782_s4 = sadd.s32 %s949_s28, %s944_s29 }
  0x1a   : > { %s182_s9 = scalar_lea.vmem %s1554_s0, %s979_s6  ;;  %s1186_s6 = smov 24  }
  0x1b   : > { %s1288_s10 = scalar_lea.vmem %s182_s9, %s948_s5  ;;  %s1187_s9 = smov 28  }
  0x1c   : > { %v1291_v0 = vld [vmem:[%s1288_s10 + $0x24] sm:$0xff]   ;;  %v1294_v1 = vld [vmem:[%s1288_s10 + $0xc] sm:$0xff]   ;;  %v1301_v2 = vld [vmem:[%s1288_s10 + $0x18] sm:$0xff]  }
  0x1d   : > { %367 = vrot.lane.b32.xlu1 %v1291_v0, %s1181_s11  ;;  %363 = vrot.lane.b32.xlu0 %v1294_v1, %s1181_s11  ;;  %v1063_v3 = vld [vmem:[%s1288_s10 + $0x20] ss:$0 sps:$4 sm:$0x11]   ;;  %v408_v5 = vshrl.u32 %v1291_v0, 16  ;;  %v329_v6 = vrot.slane %v1301_v2, 1  ;;  %v1311_v9 = vld [vmem:[%s1288_s10 + $0x24] sm:$0xff]  }
  0x1e   : > { %v1305_v4 = vld [vmem:[%s1288_s10] sm:$0xff]   ;;  %v330_v7 = vrot.slane %v1063_v3, 1  ;;  %v1065_v8 = vld [vmem:[%s1288_s10 + $0x8] ss:$0 sps:$4 sm:$0x11]   ;;  %v1315_v11 = vld [vmem:[%s1288_s10 + $0xc] sm:$0xff]  }
  0x1f   : > { %v323_v10 = vrot.slane %v1305_v4, 1  ;;  %v324_v13 = vrot.slane %v1065_v8, 1  ;;  %v1067_v14 = vld [vmem:[%s1288_s10 + $0x2c] ss:$0 sps:$4 sm:$0x11]   ;;  %v332_v15 = vrot.slane %v1311_v9, 1 }
  0x20   : > { %v331_v12 = vsel %vm322_vm0, %v329_v6, %v330_v7  ;;  %v326_v16 = vrot.slane %v1315_v11, 1  ;;  %v333_v18 = vrot.slane %v1067_v14, 1  ;;  %v1069_v19 = vld [vmem:[%s1288_s10 + $0x14] ss:$0 sps:$4 sm:$0x11]   ;;  %v279_v20 = vshrl.u32 %v1315_v11, 16 }
  0x21   : > { %339 = vrot.lane.b32.xlu1 %v331_v12, %s1182_s20  ;;  %v325_v17 = vsel %vm322_vm0, %v323_v10, %v324_v13  ;;  %v281_v21 = vshll.u32 %v1315_v11, 16  ;;  %v267_v22 = vshrl.u32 %v1305_v4, 16  ;;  %v269_v23 = vshll.u32 %v1305_v4, 16  ;;  %v1335_v36 = vld [vmem:[%s1288_s10 + $0x30] sm:$0xff]   ;;  %v1346_v52 = vld [vmem:[%s1288_s10 + $0x18] sm:$0xff]  }
  0x22   : > { %335 = vrot.lane.b32.xlu0 %v325_v17, %s1182_s20  ;;  %v334_v24 = vsel %vm322_vm0, %v332_v15, %v333_v18  ;;  %v327_v25 = vrot.slane %v1069_v19, 1  ;;  %v286_v26 = vshll.u32 %v1069_v19, 16  ;;  %v274_v27 = vshll.u32 %v1065_v8, 16  ;;  %v1072_v44 = vld [vmem:[%s1288_s10 + $0x2c] ss:$0 sps:$4 sm:$0x11]  }
  0x23   : > { %v283_v28 = vrot.slane %v281_v21, 1  ;;  %v271_v29 = vrot.slane %v269_v23, 1  ;;  %v303_v30 = vshrl.u32 %v1311_v9, 16  ;;  %v305_v31 = vshll.u32 %v1311_v9, 16 }
  0x24   : > { %v328_v32 = vsel %vm322_vm0, %v326_v16, %v327_v25  ;;  %v288_v33 = vrot.slane %v286_v26, 1  ;;  %v276_v34 = vrot.slane %v274_v27, 1  ;;  %v310_v35 = vshll.u32 %v1067_v14, 16  ;;  %v1073_v49 = vld [vmem:[%s1288_s10 + $0x14] ss:$0 sps:$4 sm:$0x11]  }
  0x25   : > { %341 = vrot.lane.b32.xlu1 %v334_v24, %s1182_s20  ;;  %v284_v37 = vor.u32 %v283_v28, %v279_v20  ;;  %v272_v38 = vor.u32 %v271_v29, %v267_v22  ;;  %v307_v39 = vrot.slane %v305_v31, 1  ;;  %v291_v40 = vshrl.u32 %v1301_v2, 16  ;;  %v1074_v58 = vld [vmem:[%s1288_s10 + $0x38] ss:$0 sps:$4 sm:$0x11]  }
  0x26   : > { %337 = vrot.lane.b32.xlu0 %v328_v32, %s1182_s20  ;;  %v312_v41 = vrot.slane %v310_v35, 1  ;;  %v293_v42 = vshll.u32 %v1301_v2, 16  ;;  %v298_v43 = vshll.u32 %v1063_v3, 16  ;;  %v410_v48 = vshll.u32 %v1291_v0, 16 }
  0x27   : > { %v289_v45 = vsel %vm265_vm1, %v284_v37, %v288_v33  ;;  %v277_v46 = vsel %vm265_vm1, %v272_v38, %v276_v34  ;;  %v308_v47 = vor.u32 %v307_v39, %v303_v30  ;;  %v415_v53 = vshll.u32 %v1072_v44, 16  ;;  %v1075_v62 = vld [vmem:[%s1288_s10 + $0x20] ss:$0 sps:$4 sm:$0x11]   ;;  %v1371_v30 = vld [vmem:[%s1288_s10 + $0x30] sm:$0xff]  }
  0x28   : > { %v295_v50 = vrot.slane %v293_v42, 1  ;;  %v300_v51 = vrot.slane %v298_v43, 1  ;;  %v412_v55 = vrot.slane %v410_v48, 1  ;;  %v386_v56 = vshll.u32 %v1294_v1, 16  ;;  %v1383_v39 = vld [vmem:[%s1288_s10 + $0x3c] sm:$0xff]  }
  0x29   : > { %316 = vrot.lane.b32.xlu1 %v289_v45, %s1183_s21  ;;  %v313_v54 = vsel %vm265_vm1, %v308_v47, %v312_v41  ;;  %v391_v57 = vshll.u32 %v1073_v49, 16  ;;  %v384_v60 = vshrl.u32 %v1294_v1, 16  ;;  %v422_v61 = vshll.u32 %v1335_v36, 16  ;;  %v1390_v41 = vld [vmem:[%s1288_s10 + $0x24] sm:$0xff]  }
  0x2a   : > { %314 = vrot.lane.b32.xlu0 %v277_v46, %s1183_s21  ;;  %v296_v59 = vor.u32 %v295_v50, %v291_v40  ;;  %v417_v63 = vrot.slane %v415_v53, 1  ;;  %v388_v3 = vrot.slane %v386_v56, 1  ;;  %v420_v8 = vshrl.u32 %v1335_v36, 16  ;;  %v1386_v40 = vld [vmem:[%s1288_s10 + $0x38] ss:$0 sps:$4 sm:$0x11]  }
  0x2b   : > { %v393_v7 = vrot.slane %v391_v57, 1  ;;  %v398_v10 = vshll.u32 %v1346_v52, 16  ;;  %v413_v12 = vor.u32 %v412_v55, %v408_v5  ;;  %v424_v13 = vrot.slane %v422_v61, 1  ;;  %v1393_v42 = vld [vmem:[%s1288_s10 + $0x20] ss:$0 sps:$4 sm:$0x11]  }
  0x2c   : > { %v301_v6 = vsel %vm265_vm1, %v296_v59, %v300_v51  ;;  %v427_v14 = vshll.u32 %v1074_v58, 16  ;;  %v389_v15 = vor.u32 %v388_v3, %v384_v60  ;;  %v396_v16 = vshrl.u32 %v1346_v52, 16  ;;  %v1085_v56 = vld [vmem:[%s1555_s1 + $0x8] sm:$0xff]  }
  0x2d   : > { %320 = vrot.lane.b32.xlu1 %v313_v54, %s1183_s21  ;;  %v400_v17 = vrot.slane %v398_v10, 1  ;;  %v403_v18 = vshll.u32 %v1075_v62, 16  ;;  %v418_v19 = vsel %vm265_vm1, %v413_v12, %v417_v63  ;;  %v425_v20 = vor.u32 %v424_v13, %v420_v8  ;;  %v1083_v54 = vld [vmem:[%s1288_s10 + $0x2c] ss:$0 sps:$4 sm:$0x11]   ;;  %v1086_v8 = vld [vmem:[%s1555_s1] sm:$0xff]  }
  0x2e   : > { %318 = vrot.lane.b32.xlu0 %v301_v6, %s1183_s21  ;;  %v429_v21 = vrot.slane %v427_v14, 1  ;;  %v394_v5 = vsel %vm265_vm1, %v389_v15, %v393_v7  ;;  %v445_v25 = vrot.slane %v1291_v0, 1  ;;  %v446_v26 = vrot.slane %v1072_v44, 1  ;;  %v1084_v44 = vld [vmem:[%s1555_s1 + $0x10] ss:$0 sps:$4 sm:$0x33]  }
  0x2f   : > { %v401_v22 = vor.u32 %v400_v17, %v396_v16  ;;  %v405_v23 = vrot.slane %v403_v18, 1  ;;  %v439_v28 = vrot.slane %v1294_v1, 1  ;;  %v440_v29 = vrot.slane %v1073_v49, 1  ;;  %v1378_v1 = vld [vmem:[%s1288_s10 + $0x18] sm:$0xff]   ;;  %977 = vmatprep.subr.msk.bf16.mxu0 %vm676_vm2, %v1084_v44  ;;  %978 = vmatprep.subr.msk.bf16.mxu1 %vm676_vm2, %v1084_v44 }
  0x30   : > { %v430_v24 = vsel %vm265_vm1, %v425_v20, %v429_v21  ;;  %v447_v31 = vsel %vm322_vm0, %v445_v25, %v446_v26  ;;  %v448_v32 = vrot.slane %v1335_v36, 1  ;;  %v449_v33 = vrot.slane %v1074_v58, 1  ;;  %v1403_v49 = vld [vmem:[%s1288_s10 + $0x44] ss:$0 sps:$4 sm:$0x11]   ;;  %s1188_s10 = smov 32  }
  0x31   : > { %369 = vrot.lane.b32.xlu1 %v1335_v36, %s1181_s11  ;;  %v406_v27 = vsel %vm265_vm1, %v401_v22, %v405_v23  ;;  %v441_v0 = vsel %vm322_vm0, %v439_v28, %v440_v29  ;;  %v442_v34 = vrot.slane %v1346_v52, 1  ;;  %v443_v35 = vrot.slane %v1075_v62, 1 }
  0x32   : > { %365 = vrot.lane.b32.xlu0 %v1346_v52, %s1181_s11  ;;  %v526_v37 = vshll.u32 %v1371_v30, 16  ;;  %v450_v38 = vsel %vm322_vm0, %v448_v32, %v449_v33  ;;  %v502_v43 = vshll.u32 %v1378_v1, 16  ;;  %v524_v45 = vshrl.u32 %v1371_v30, 16  ;;  %s175_s11 = sand.u32 1, %s1155_s13  }
  0x33   : > { %v444_v36 = vsel %vm322_vm0, %v442_v34, %v443_v35  ;;  %v500_v47 = vshrl.u32 %v1378_v1, 16  ;;  %v531_v48 = vshll.u32 %v1386_v40, 16  ;;  %v538_v50 = vshll.u32 %v1383_v39, 16  ;;  %s876_s21 = sshll.u32 %s175_s11, 6 }
  0x34   : > { %v528_v46 = vrot.slane %v526_v37, 1  ;;  %v678_v51 = vsel %vm676_vm2, %v1084_v44, 0  ;;  %v504_v52 = vrot.slane %v502_v43, 1  ;;  %v507_v53 = vshll.u32 %v1393_v42, 16  ;;  %s177_s5 = scalar_lea.vmem [#allocation2], %s876_s21  ;;  %s1189_s21 = smov [#allocation2]  }
  0x35   : > { %435 = vrot.lane.b32.xlu1 %v418_v19, %s1184_s24  ;;  %v514_v55 = vshll.u32 %v1390_v41, 16  ;;  %958 = vmatpush3.bf16.msra.mxu0 %v678_v51  ;;  %v536_v57 = vshrl.u32 %v1383_v39, 16  ;;  %v512_v58 = vshrl.u32 %v1390_v41, 16  ;;  %v533_v60 = vrot.slane %v531_v48, 1  ;;  %s785_s15 = sshll.u32 %s177_s5, 4  ;;  %s1496_s15 = int_to_ptr.vmem [resolvable:$true] %s785_s15 }
  0x36   : > { %431 = vrot.lane.b32.xlu0 %v394_v5, %s1184_s24  ;;  %974 = vmatpush3.bf16.msra.mxu1 %v678_v51  ;;  %v529_v59 = vor.u32 %v528_v46, %v524_v45  ;;  %v540_v61 = vrot.slane %v538_v50, 1  ;;  %v543_v62 = vshll.u32 %v1403_v49, 16  ;;  %v505_v63 = vor.u32 %v504_v52, %v500_v47 }
  0x37   : > { %959 = vmatprep.subr.bf16.mxu0 %v1085_v56  ;;  %v509_v3 = vrot.slane %v507_v53, 1  ;;  %v516_v6 = vrot.slane %v514_v55, 1  ;;  %v519_v7 = vshll.u32 %v1083_v54, 16  ;;  %972 = vmatprep.subr.bf16.mxu1 %v1085_v56  ;;  %v561_v18 = vrot.slane %v1371_v30, 1 }
  0x38   : > { %v534_v10 = vsel %vm265_vm1, %v529_v59, %v533_v60  ;;  %v541_v12 = vor.u32 %v540_v61, %v536_v57  ;;  %v545_v13 = vrot.slane %v543_v62, 1  ;;  %v562_v19 = vrot.slane %v1386_v40, 1 }
  0x39   : > { %437 = vrot.lane.b32.xlu1 %v430_v24, %s1184_s24  ;;  %960 = vmatpush3.bf16.msra.mxu0 %v1085_v56  ;;  %v510_v14 = vsel %vm265_vm1, %v505_v63, %v509_v3  ;;  %v517_v15 = vor.u32 %v516_v6, %v512_v58  ;;  %v521_v16 = vrot.slane %v519_v7, 1  ;;  %v555_v21 = vrot.slane %v1378_v1, 1 }
  0x3a   : > { %433 = vrot.lane.b32.xlu0 %v406_v27, %s1184_s24  ;;  %975 = vmatpush3.bf16.msra.mxu1 %v1085_v56  ;;  %v546_v17 = vsel %vm265_vm1, %v541_v12, %v545_v13  ;;  %v556_v5 = vrot.slane %v1393_v42, 1  ;;  %v563_v22 = vsel %vm322_vm0, %v561_v18, %v562_v19  ;;  %v564_v23 = vrot.slane %v1383_v39, 1  ;;  %s1091_s24 = sshll.u32 %s1189_s21, 4  ;;  %s1092_s24 = int_to_ptr.vmem [resolvable:$false] %s1091_s24 }
  0x3b   : > { %961 = vmatprep.subr.bf16.mxu0 %v1086_v8  ;;  %973 = vmatprep.subr.bf16.mxu1 %v1086_v8  ;;  %v522_v20 = vsel %vm265_vm1, %v517_v15, %v521_v16  ;;  %v565_v24 = vrot.slane %v1403_v49, 1  ;;  %v558_v26 = vrot.slane %v1390_v41, 1  ;;  %v559_v27 = vrot.slane %v1083_v54, 1  ;;  %p1094_p2 = scmp.lt.s32.totalorder %s1496_s15, %s1092_s24 }
  0x3c   : > { %v557_v25 = vsel %vm322_vm0, %v555_v21, %v556_v5 }
  0x3d   : > { %455 = vrot.lane.b32.xlu1 %v447_v31, %s1185_s27  ;;  %962 = vmatpush3.bf16.msra.mxu0 %v1086_v8  ;;  %v566_v28 = vsel %vm322_vm0, %v564_v23, %v565_v24  ;;  %v560_v29 = vsel %vm322_vm0, %v558_v26, %v559_v27 }
  0x3e   : > { %451 = vrot.lane.b32.xlu0 %v441_v0, %s1185_s27  ;;  %976 = vmatpush3.bf16.msra.mxu1 %v1086_v8 }
  0x41   : > { %457 = vrot.lane.b32.xlu1 %v450_v38, %s1185_s27 }
  0x42   : > { %453 = vrot.lane.b32.xlu0 %v444_v36, %s1185_s27  ;;  %s1093_s27 = scalar_lea.vmem %s1092_s24, 2048 }
  0x45   : > { %483 = vrot.lane.b32.xlu1 %v1371_v30, %s1186_s6 }
  0x46   : > { %479 = vrot.lane.b32.xlu0 %v1378_v1, %s1186_s6 }
  0x49   : > { %485 = vrot.lane.b32.xlu1 %v1383_v39, %s1186_s6 }
  0x4a   : > { %481 = vrot.lane.b32.xlu0 %v1390_v41, %s1186_s6  ;;  %s945_s6 = sshll.u32 %s782_s4, 7 }
  0x4b   : > { %s1493_s8 = scalar_lea.hbm %s1557_s3, %s945_s6 }
  0x4d   : > { %551 = vrot.lane.b32.xlu1 %v534_v10, %s1187_s9 }
  0x4e   : > { %547 = vrot.lane.b32.xlu0 %v510_v14, %s1187_s9 }
  0x51   : > { %553 = vrot.lane.b32.xlu1 %v546_v17, %s1187_s9 }
  0x52   : > { %549 = vrot.lane.b32.xlu0 %v522_v20, %s1187_s9  ;;  %s1502_s9 = scalar_lea.sflag [#allocation3], %s175_s11 }
  0x55   : > { %571 = vrot.lane.b32.xlu1 %v563_v22, %s1188_s10 }
  0x56   : > { %567 = vrot.lane.b32.xlu0 %v557_v25, %s1188_s10 }
  0x59   : > { %573 = vrot.lane.b32.xlu1 %v566_v28, %s1188_s10 }
  0x5a   : > { %569 = vrot.lane.b32.xlu0 %v560_v29, %s1188_s10  ;;  %s1087_s10 = scalar_lea.vmem %s1496_s15, 1024 }
  0x5b   : > { %p1088_p13 = scmp.ne.s32.totalorder %s1496_s15, %s1087_s10  ;;  %p1095_p4 = scmp.lt.s32.totalorder %s1093_s27, %s1087_s10 }
  0x5d   : > { %p1089_p0 = pnand %p1088_p13, %p1262_p3  ;;  %p1096_p5 = por %p1095_p4, %p1094_p2 }
  0x5f   : > { %p1090_p1 = pneg %p1089_p0 }
  0x61   : > { %p1097_p6 = pnand %p1096_p5, %p1090_p1 }
  0x8f   : > { %v368_v30 = vpop.permute.xlu1 %367  ;;  %v364_v31 = vpop.permute.xlu0 %363 }
  0x93   : > { %v340_v32 = vpop.permute.xlu1 %339 }
  0x94   : > { %v336_v33 = vpop.permute.xlu0 %335 }
  0x97   : > { %v342_v0 = vpop.permute.xlu1 %341 }
  0x98   : > { %v338_v34 = vpop.permute.xlu0 %337 }
  0x9b   : > { %v317_v35 = vpop.permute.xlu1 %316 }
  0x9c   : > { %v315_v1 = vpop.permute.xlu0 %314  ;;  %v579_v60 = vsel %vm575_vm3, %v1315_v11, %v317_v35 }
  0x9d   : > { %v577_v53 = vsel %vm575_vm3, %v1305_v4, %v315_v1  ;;  %v588_v8 = vsel %vm584_vm4, %v579_v60, %v338_v34 }
  0x9e   : > { %v586_v57 = vsel %vm584_vm4, %v577_v53, %v336_v33 }
  0x9f   : > { %v321_v37 = vpop.permute.xlu1 %320  ;;  %v595_v61 = vsel %vm593_vm5, %v586_v57, %v364_v31 }
  0xa0   : > { %v319_v38 = vpop.permute.xlu0 %318  ;;  %v583_v58 = vsel %vm575_vm3, %v1311_v9, %v321_v37 }
  0xa1   : > { %v581_v52 = vsel %vm575_vm3, %v1301_v2, %v319_v38  ;;  %v592_v9 = vsel %vm584_vm4, %v583_v58, %v342_v0 }
  0xa2   : > { %v590_v55 = vsel %vm584_vm4, %v581_v52, %v340_v32 }
  0xa3   : > { %v370_v39 = vpop.permute.xlu1 %369  ;;  %v599_v59 = vsel %vm593_vm5, %v590_v55, %v368_v30  ;;  %v940_v30 = vld [vmem:[%s1556_s2] ss:$0 sm:$0xff] }
  0xa4   : > { %v366_v40 = vpop.permute.xlu0 %365  ;;  %v601_v11 = vsel %vm593_vm5, %v592_v9, %v370_v39 }
  0xa5   : > { %v597_v14 = vsel %vm593_vm5, %v588_v8, %v366_v40 }
  0xa7   : > { %v436_v36 = vpop.permute.xlu1 %435 }
  0xa8   : > { %v432_v41 = vpop.permute.xlu0 %431  ;;  %v608_v4 = vsel %vm602_vm6, %v599_v59, %v436_v36 }
  0xa9   : > { %v604_v63 = vsel %vm602_vm6, %v595_v61, %v432_v41 }
  0xab   : > { %v438_v42 = vpop.permute.xlu1 %437 }
  0xac   : > { %v434_v43 = vpop.permute.xlu0 %433  ;;  %v610_v15 = vsel %vm602_vm6, %v601_v11, %v438_v42 }
  0xad   : > { %v606_v19 = vsel %vm602_vm6, %v597_v14, %v434_v43 }
  0xaf   : > { %v456_v44 = vpop.permute.xlu1 %455 }
  0xb0   : > { %v452_v45 = vpop.permute.xlu0 %451  ;;  %v617_v3 = vsel %vm611_vm7, %v608_v4, %v456_v44 }
  0xb1   : > { %v613_v6 = vsel %vm611_vm7, %v604_v63, %v452_v45 }
  0xb3   : > { %v458_v46 = vpop.permute.xlu1 %457 }
  0xb4   : > { %v454_v47 = vpop.permute.xlu0 %453  ;;  %v619_v20 = vsel %vm611_vm7, %v610_v15, %v458_v46 }
  0xb5   : > { %v615_v5 = vsel %vm611_vm7, %v606_v19, %v454_v47 }
  0xb7   : > { %v484_v48 = vpop.permute.xlu1 %483 }
  0xb8   : > { %v480_v49 = vpop.permute.xlu0 %479  ;;  %v626_v7 = vsel %vm620_vm8, %v617_v3, %v484_v48 }
  0xb9   : > { %v622_v10 = vsel %vm620_vm8, %v613_v6, %v480_v49 }
  0xbb   : > { %v486_v50 = vpop.permute.xlu1 %485 }
  0xbc   : > { %v482_v51 = vpop.permute.xlu0 %481  ;;  %v628_v22 = vsel %vm620_vm8, %v619_v20, %v486_v50 }
  0xbd   : > { %v624_v23 = vsel %vm620_vm8, %v615_v5, %v482_v51 }
  0xbf   : > { %v552_v54 = vpop.permute.xlu1 %551 }
  0xc0   : > { %v548_v56 = vpop.permute.xlu0 %547  ;;  %v635_v12 = vsel %vm629_vm9, %v626_v7, %v552_v54 }
  0xc1   : > { %v631_v16 = vsel %vm629_vm9, %v622_v10, %v548_v56 }
  0xc3   : > { %v554_v2 = vpop.permute.xlu1 %553 }
  0xc4   : > { %v550_v62 = vpop.permute.xlu0 %549  ;;  %v637_v24 = vsel %vm629_vm9, %v628_v22, %v554_v2 }
  0xc5   : > { %v633_v26 = vsel %vm629_vm9, %v624_v23, %v550_v62 }
  0xc7   : > { %v572_v13 = vpop.permute.xlu1 %571 }
  0xc8   : > { %v568_v17 = vpop.permute.xlu0 %567  ;;  %v644_v18 = vsel %vm638_vm10, %v635_v12, %v572_v13 }
  0xc9   : > { %v640_v21 = vsel %vm638_vm10, %v631_v16, %v568_v17  ;;  %967 = vmatprep.mubr.msk.bf16.mxu1 %vm667_vm11, %v644_v18 }
  0xca   : > { %963 = vmatprep.mubr.msk.bf16.mxu0 %vm667_vm11, %v640_v21 }
  0xcb   : > { %v574_v25 = vpop.permute.xlu1 %573 }
  0xcc   : > { %v646_v27 = vsel %vm638_vm10, %v637_v24, %v574_v25  ;;  %v570_v28 = vpop.permute.xlu0 %569 }
  0xcd   : > { %v642_v29 = vsel %vm638_vm10, %v633_v26, %v570_v28  ;;  %968 = vmatmul.mubr.msk.bf16.vlgmr.msra.gmra.mxu1 %vm667_vm11, %v646_v27 }
  0xce   : > { %964 = vmatmul.mubr.msk.bf16.vlgmr.msra.gmra.mxu0 %vm667_vm11, %v642_v29 }
 0x18d   : > { %v969_v31 = vpop.f32.mrf.mxu1 }
 0x18e   : > { %v965_v32 = vpop.f32.mrf.mxu0  ;;  %v758_v33 = vadd.f32 %v969_v31, %v940_v30 }
 0x18f   : > { %v754_v0 = vadd.f32 %v965_v32, %v940_v30  ;;  %v730_v34 = vpop.f32.mrf.mxu1 }
 0x190   : > { %766 = vst.msk [vmem:[%s177_s5 + $0x30] sm:$0xff] %vm602_vm6, %v758_v33  ;;  %v714_v35 = vpop.f32.mrf.mxu0  ;;  %v756_v1 = vadd.f32 %v940_v30, %v730_v34 }
 0x191   : > { %762 = vst.msk [vmem:[%s177_s5 + $0x10] sm:$0xff] %vm602_vm6, %v754_v0  ;;  %v752_v37 = vadd.f32 %v940_v30, %v714_v35  ;;  %v970_v38 = vpop.f32.mrf.mxu1 }
 0x192   : > { %764 = vst.msk [vmem:[%s177_s5 + $0x20] sm:$0xff] %vm602_vm6, %v756_v1  ;;  %v966_v39 = vpop.f32.mrf.mxu0  ;;  %v759_v40 = vadd.f32 %v970_v38, %v940_v30 }
 0x193   : > { %760 = vst.msk [vmem:[%s177_s5] sm:$0xff] %vm602_vm6, %v752_v37  ;;  %v755_v36 = vadd.f32 %v966_v39, %v940_v30  ;;  %v733_v41 = vpop.f32.mrf.mxu1 }
 0x194   : > { %767 = vst.msk [vmem:[%s177_s5 + $0x38] sm:$0xff] %vm602_vm6, %v759_v40  ;;  %v717_v42 = vpop.f32.mrf.mxu0  ;;  %v757_v43 = vadd.f32 %v940_v30, %v733_v41 }
 0x195   : > { %763 = vst.msk [vmem:[%s177_s5 + $0x18] sm:$0xff] %vm602_vm6, %v755_v36  ;;  %v753_v44 = vadd.f32 %v940_v30, %v717_v42 }
 0x196   : > { %765 = vst.msk [vmem:[%s177_s5 + $0x28] sm:$0xff] %vm602_vm6, %v757_v43 }
 0x197   : > { %761 = vst.msk [vmem:[%s177_s5 + $0x8] sm:$0xff] %vm602_vm6, %v753_v44 }
 0x198   : > { %1100 = shalt.err (!%p1097_p6)
}
 0x199   : > { %s1101_s11 = scalar_lea.hbm %s1493_s8, 1024  ;;  %s1105_s4 = scalar_lea.hbm %s1557_s3, 8192 }
 0x19a   : > { %p1102_p7 = scmp.ne.s32.totalorder %s1493_s8, %s1101_s11  ;;  %p1106_p11 = scmp.lt.s32.totalorder %s1493_s8, %s1557_s3 }
 0x19b   : > { %p1107_p12 = scmp.lt.s32.totalorder %s1105_s4, %s1101_s11 }
 0x19c   : > { %p1103_p9 = pnand %p1102_p7, %p1262_p3 }
 0x19d   : > { %p1108_p13 = por %p1107_p12, %p1106_p11 }
 0x19e   : > { %p1104_p10 = pneg %p1103_p9 }
 0x1a0   : > { %p1109_p0 = pnand %p1108_p13, %p1104_p10 }
 0x1a2   : > { %1112 = shalt.err (!%p1109_p0)
}
 0x1a3   : > { %s1190_s16 = smov 128  }
 0x1a4   : > { %980 = dma.vmem_to_hbm [thread:$0]  (%p1262_p3), %s1496_s15, 1024, %s1493_s8, %s1502_s9, %s1190_s16, %s1190_s16, %s1182_s20  }
 0x1a5 PF: > { %p986_p1 = scmp.ge.s32.totalorder %s1179_s19, 2  ;;  %s800_s7 = sand.u32 1, %s1151_s12  }
 0x1a6   : > { %s801_s10 = scalar_lea.sflag [#allocation3], %s800_s7 }
 0x1a7   : > { %p983_p2 = pnand %p986_p1, %p1271_p8 }
 0x1a9   : > { %p984_p4 = pneg %p983_p2 }
 0x1ab   : > { %1146 = dma.done.wait (%p984_p4), %s801_s10, 1024  }
 0x1ac   : > { %1148 = vsyncadd (%p984_p4), %s801_s10, 4294966272  ;;  %s16_s19 = sadd.s32 1, %s1179_s19   ;;  %s1560_s12 = smov %s1155_s13 }
 0x1ad   : > { %p13_p5 = scmp.ge.s32.totalorder %s16_s19, 10   ;;  %s1561_s13 = smov %s1159_s14 }
 0x1ae   : > { %s1562_s14 = smov %s1280_s30  ;;  %s1563_s15 = smov %s1171_s17 }
 0x1af   : > { %s1564_s16 = smov %s1175_s18  ;;  %s1565_s17 = smov %s1568_s22 }
 0x1b0   : > { %s1566_s18 = smov %s1572_s23  ;;  %15 = sbr.rel (!%p13_p5) target bundleno = 5 (0x5), region = 70 }
 0x1b5   :  { %806 = vsyncpa [#allocation3], 1 }
 0x1b6   :  { %808 = vsyncpa [#allocation3 + $0x1], 1 }

</bundles_post_ra>
